<compile_context>
chip_gen: v7x
topology: tpu7x:2x2x1
jax: 0.10.0
libtpu: 0.0.40
codegen_flags: <defaults>
</compile_context>

<pallas_src>
import functools
import math

import jax
import jax.numpy as jnp
from jax.experimental import pallas as pl
from jax.experimental.pallas import tpu as pltpu


# ---------------------------------------------------------------------------
# fused kernel: one batch per grid step (all entities folded into the block)
# ---------------------------------------------------------------------------
def _wga_batch_kernel(u1b_ref, u2b_ref, k1_ref, v1_ref, k2_ref, v2_ref, scat_ref,
                      out_ref, *, inv_sqrt_d, inv_n1, inv_n2, neg_slope):
    _, E, N1, D = v1_ref.shape
    N2 = v2_ref.shape[2]

    u1b = u1b_ref[0]      # (N1*D, N1)  block-diag effective query, hop 1
    u2b = u2b_ref[0]      # (N2*D, N2)  block-diag effective query, hop 2
    k1 = k1_ref[0]        # (E, N1*D)
    v1 = v1_ref[0]        # (E, N1, D)
    k2 = k2_ref[0]        # (E*N1, N2*D)
    v2 = v2_ref[0]        # (E*N1, N2, D)
    scat = scat_ref[0]    # (S, E) one-hot scatter matrix (torch.nonzero order)

    # -------- hop-2 attention: MXU scores, lane-dense softmax over N2 --------
    # s2[r, n] = K_2[r, n, :] . u2   (zero-padded neighbours give exactly 0)
    s2 = jnp.dot(k2, u2b, preferred_element_type=jnp.float32) * inv_sqrt_d  # (E*N1, N2)
    s2 = jnp.where(s2 == 0.0, -10000.0, s2)          # masked_fill(score == 0, -1e4)
    s2 = jnp.where(s2 > 0.0, s2, neg_slope * s2)     # LeakyReLU
    e2 = jnp.exp(s2 - jnp.max(s2, axis=-1, keepdims=True))
    a2 = e2 / jnp.sum(e2, axis=-1, keepdims=True)
    a2 = jnp.where(a2 == inv_n2, 0.0, a2)            # zero fully-masked rows

    # hop-2 context: batched (1, N2) @ (N2, D) per (entity, hop-1 neighbour)
    ctx2 = jnp.einsum('rqn,rnd->rqd', a2[:, None, :], v2,
                      preferred_element_type=jnp.float32)        # (E*N1, 1, D)
    ctx2 = ctx2.reshape(E, N1, D)

    # -------- hop-1 attention: MXU scores, lane-dense softmax over N1 --------
    s1 = jnp.dot(k1, u1b, preferred_element_type=jnp.float32) * inv_sqrt_d  # (E, N1)
    s1 = jnp.where(s1 == 0.0, -10000.0, s1)
    s1 = jnp.where(s1 > 0.0, s1, neg_slope * s1)
    e1 = jnp.exp(s1 - jnp.max(s1, axis=-1, keepdims=True))
    a1 = e1 / jnp.sum(e1, axis=-1, keepdims=True)
    a1 = jnp.where(a1 == inv_n1, 0.0, a1)            # (E, N1)

    # weighted sum over [V_1 | hop-2 context], torch.cat order
    v1cat = jnp.concatenate([v1, ctx2], axis=-1)                 # (E, N1, 2D)
    comb = jnp.einsum('eqn,enf->eqf', a1[:, None, :], v1cat,
                      preferred_element_type=jnp.float32)        # (E, 1, 2D)
    combined = comb.reshape(E, 2 * D)

    # -------- torch.nonzero scatter as a single MXU matmul, one dense store ----
    out_ref[0] = jnp.dot(scat, combined,
                         preferred_element_type=jnp.float32).astype(out_ref.dtype)


# ---------------------------------------------------------------------------
# wrapper
# ---------------------------------------------------------------------------
def word_graph_attention_entity(input_ent, q, k_1, v_1, k_2, v_2, params,
                                vmem_limit_bytes=None):
    """Forward pass of WordGraphAttention, mode='entity', neighbor_hop=2."""
    B, S = input_ent.shape
    _, E, N1, D = k_1.shape
    N2 = k_2.shape[3]
    hp = jax.lax.Precision.HIGHEST

    # ---- hoisted, batch-only query projections (tiny; computed once per call) ----
    q_cls = q[:, 0, :]                                            # (B, Q_dim)
    q1 = jnp.tanh(jnp.einsum('bq,dq->bd', q_cls, params['wq1'], precision=hp)
                  + params['bq1'][:, 0][None, :])
    q2 = jnp.tanh(jnp.einsum('bq,dq->bd', q_cls, params['wq2'], precision=hp)
                  + params['bq2'][:, 0][None, :])
    # fold K_V_linear into the query:  (K @ Wk^T) . Qp == K . (Qp @ Wk)
    u1 = jnp.einsum('bo,oi->bi', q1, params['wk1'], precision=hp)  # (B, D)
    u2 = jnp.einsum('bo,oi->bi', q2, params['wk2'], precision=hp)  # (B, D)

    # block-diagonal effective-query matrices so the in-kernel score is ONE
    # lane-dense MXU matmul producing (rows, N) directly:
    #   u_blk[n*D + d, m] = u[d] * (n == m)
    eye1 = jnp.eye(N1, dtype=u1.dtype)
    eye2 = jnp.eye(N2, dtype=u2.dtype)
    u1blk = (u1[:, None, :, None] * eye1[None, :, None, :]).reshape(B, N1 * D, N1)
    u2blk = (u2[:, None, :, None] * eye2[None, :, None, :]).reshape(B, N2 * D, N2)

    # contiguity-preserving reshapes (free in XLA)
    k1_2d = k_1.reshape(B, E, N1 * D)
    k2_2d = k_2.reshape(B, E * N1, N2 * D)
    v2_3d = v_2.reshape(B, E * N1, N2, D)

    # scatter matrix: the i-th nonzero position of input_ent[b] receives entity i
    nonzero = input_ent != 0
    rank = jnp.cumsum(nonzero.astype(jnp.int32), axis=1) - 1
    scat = (jax.nn.one_hot(rank, E, dtype=q.dtype)
            * nonzero[..., None].astype(q.dtype))                 # (B, S, E)

    kernel = functools.partial(
        _wga_batch_kernel,
        inv_sqrt_d=1.0 / math.sqrt(D),
        inv_n1=1.0 / N1, inv_n2=1.0 / N2, neg_slope=0.01)

    out = pl.pallas_call(
        kernel,
        out_shape=jax.ShapeDtypeStruct((B, S, 2 * D), q.dtype),
        grid=(B,),
        in_specs=[
            pl.BlockSpec((1, N1 * D, N1), lambda b: (b, 0, 0)),        # u1 block-diag
            pl.BlockSpec((1, N2 * D, N2), lambda b: (b, 0, 0)),        # u2 block-diag
            pl.BlockSpec((1, E, N1 * D), lambda b: (b, 0, 0)),         # k_1 (flat)
            pl.BlockSpec((1, E, N1, D), lambda b: (b, 0, 0, 0)),       # v_1
            pl.BlockSpec((1, E * N1, N2 * D), lambda b: (b, 0, 0)),    # k_2 (flat)
            pl.BlockSpec((1, E * N1, N2, D), lambda b: (b, 0, 0, 0)),  # v_2
            pl.BlockSpec((1, S, E), lambda b: (b, 0, 0)),              # scatter matrix
        ],
        out_specs=pl.BlockSpec((1, S, 2 * D), lambda b: (b, 0, 0)),
        compiler_params=pltpu.CompilerParams(
            dimension_semantics=("parallel",),
            vmem_limit_bytes=vmem_limit_bytes),
    )(u1blk, u2blk, k1_2d, v_1, k2_2d, v2_3d, scat)

    return out                                                   # (B, S, 2*D)


# ---------------------------------------------------------------------------
# pure-JAX reference (torch-faithful op order) for correctness checking
# ---------------------------------------------------------------------------
def _ref_forward_entity(input_ent, q_full, k_1, v_1, k_2, v_2, params):
    hp = jax.lax.Precision.HIGHEST
    B, S = input_ent.shape
    _, E, N1, D = k_1.shape
    N2 = k_2.shape[3]
    q = q_full[:, 0, :]

    q1 = jnp.tanh(jnp.einsum("bq,dq->bd", q, params["wq1"], precision=hp)
                  + params["bq1"][:, 0][None, :])
    q2 = jnp.tanh(jnp.einsum("bq,dq->bd", q, params["wq2"], precision=hp)
                  + params["bq2"][:, 0][None, :])

    # hop 2 (torch order: project K_2, then dot with Q_2)
    kp2 = jnp.einsum("benmi,oi->benmo", k_2, params["wk2"], precision=hp)
    s2 = jnp.einsum("benmo,bo->benm", kp2, q2, precision=hp) / math.sqrt(D)
    s2 = jnp.where(s2 == 0.0, -10000.0, s2)
    s2 = jnp.where(s2 > 0.0, s2, 0.01 * s2)
    e2 = jnp.exp(s2 - jnp.max(s2, axis=3, keepdims=True))
    a2 = e2 / jnp.sum(e2, axis=3, keepdims=True)
    a2 = jnp.where(a2 == 1.0 / N2, 0.0, a2)
    ctx2 = jnp.einsum("benm,benmd->bend", a2, v_2, precision=hp)
    v1cat = jnp.concatenate([v_1, ctx2], axis=-1)

    # hop 1
    kp1 = jnp.einsum("beni,oi->beno", k_1, params["wk1"], precision=hp)
    s1 = jnp.einsum("beno,bo->ben", kp1, q1, precision=hp) / math.sqrt(D)
    s1 = jnp.where(s1 == 0.0, -10000.0, s1)
    s1 = jnp.where(s1 > 0.0, s1, 0.01 * s1)
    e1 = jnp.exp(s1 - jnp.max(s1, axis=2, keepdims=True))
    a1 = e1 / jnp.sum(e1, axis=2, keepdims=True)
    a1 = jnp.where(a1 == 1.0 / N1, 0.0, a1)
    combined = jnp.einsum("ben,benf->bef", a1, v1cat, precision=hp)

    # torch.nonzero + python scatter loop, expressed as a one-hot matmul
    nonzero = input_ent != 0
    rank = jnp.cumsum(nonzero.astype(jnp.int32), axis=1) - 1
    scat = (jax.nn.one_hot(rank, E, dtype=combined.dtype)
            * nonzero[..., None].astype(combined.dtype))
    return jnp.einsum("bse,bef->bsf", scat, combined, precision=hp)


# ---------------------------------------------------------------------------
if __name__ == "__main__":
    B, S = 2, 8
    E, N1, N2 = 4, 4, 4          # entities / hop-1 / hop-2 neighbours (powers of 2
                                 # so the module's `attention == 1/N` mask is exact)
    D, QD = 32, 64               # K_V_dim, Q_dim

    root = jax.random.PRNGKey(0)
    ks = jax.random.split(root, 12)

    params = {
        "wq1": 0.1 * jax.random.normal(ks[0], (D, QD), jnp.float32),
        "bq1": 0.1 * jax.random.normal(ks[1], (D, 1), jnp.float32),
        "wk1": 0.3 * jax.random.normal(ks[2], (D, D), jnp.float32),
        "wq2": 0.1 * jax.random.normal(ks[3], (D, QD), jnp.float32),
        "bq2": 0.1 * jax.random.normal(ks[4], (D, 1), jnp.float32),
        "wk2": 0.3 * jax.random.normal(ks[5], (D, D), jnp.float32),
    }

    q_full = jax.random.normal(ks[6], (B, S, QD), jnp.float32)
    k_1 = jax.random.normal(ks[7], (B, E, N1, D), jnp.float32)
    v_1 = jax.random.normal(ks[8], (B, E, N1, D), jnp.float32)
    k_2 = jax.random.normal(ks[9], (B, E, N1, N2, D), jnp.float32)
    v_2 = jax.random.normal(ks[10], (B, E, N1, N2, D), jnp.float32)

    # graph padding (zero neighbour vectors) -> exercises the masked_fill paths
    slot_mask = jnp.array([[1., 1., 1., 0.],
                           [1., 1., 1., 1.]], jnp.float32)               # (B, E)
    nb1_mask = (jax.random.uniform(ks[11], (B, E, N1)) > 0.25).astype(jnp.float32)
    nb2_mask = (jax.random.uniform(jax.random.fold_in(root, 99),
                                   (B, E, N1, N2)) > 0.3).astype(jnp.float32)
    nb2_mask = nb2_mask.at[0, 0, 0, :].set(0.0)      # one fully padded hop-2 group

    m1 = slot_mask[:, :, None] * nb1_mask                                # (B, E, N1)
    k_1 = k_1 * m1[..., None]
    v_1 = v_1 * m1[..., None]
    m2 = m1[..., None] * nb2_mask                                        # (B, E, N1, N2)
    k_2 = k_2 * m2[..., None]
    v_2 = v_2 * m2[..., None]

    # entity positions: the i-th nonzero of a row receives entity i of that batch
    input_ent = jnp.array([[0, 5, 0, 0, 7, 0, 9, 0],
                           [3, 0, 4, 6, 0, 0, 0, 8]], jnp.int32)

    out = word_graph_attention_entity(input_ent, q_full, k_1, v_1, k_2, v_2, params)
    out = jax.block_until_ready(out)

    ref = _ref_forward_entity(input_ent, q_full, k_1, v_1, k_2, v_2, params)
    err = float(jnp.max(jnp.abs(out - ref)))
    assert err < 2e-3, f"max abs err vs reference: {err}"

    print("KERNEL_OK")
</pallas_src>

<mosaic_0001>
module attributes {stable_mosaic.version = 11 : i64} {
  func.func @_wga_batch_kernel(%arg0: i32, %arg1: memref<1x128x4xf32, #tpu.memory_space<vmem>>, %arg2: memref<1x128x4xf32, #tpu.memory_space<vmem>>, %arg3: memref<1x4x128xf32, #tpu.memory_space<vmem>>, %arg4: memref<1x4x4x32xf32, #tpu.memory_space<vmem>>, %arg5: memref<1x16x128xf32, #tpu.memory_space<vmem>>, %arg6: memref<1x16x4x32xf32, #tpu.memory_space<vmem>>, %arg7: memref<1x8x4xf32, #tpu.memory_space<vmem>>, %arg8: memref<1x8x64xf32, #tpu.memory_space<vmem>>) attributes {dimension_semantics = [#tpu.dimension_semantics<parallel>], iteration_bounds = array<i64: 2>, scalar_prefetch = 0 : i64, scratch_operands = 0 : i64, tpu.core_type = #tpu.core_type<tc>, window_params = [{transform_indices = @transform_0, window_bounds = array<i64: 1, 128, 4>}, {transform_indices = @transform_1, window_bounds = array<i64: 1, 128, 4>}, {transform_indices = @transform_2, window_bounds = array<i64: 1, 4, 128>}, {transform_indices = @transform_3, window_bounds = array<i64: 1, 4, 4, 32>}, {transform_indices = @transform_4, window_bounds = array<i64: 1, 16, 128>}, {transform_indices = @transform_5, window_bounds = array<i64: 1, 16, 4, 32>}, {transform_indices = @transform_6, window_bounds = array<i64: 1, 8, 4>}, {transform_indices = @transform_7, window_bounds = array<i64: 1, 8, 64>}]} {
    %c0 = arith.constant 0 : index
    %c0_0 = arith.constant 0 : index
    %c0_1 = arith.constant 0 : index
    %0 = vector.load %arg1[%c0, %c0_0, %c0_1] : memref<1x128x4xf32, #tpu.memory_space<vmem>>, vector<1x128x4xf32>
    %1 = vector.shape_cast %0 : vector<1x128x4xf32> to vector<128x4xf32>
    %c0_2 = arith.constant 0 : index
    %c0_3 = arith.constant 0 : index
    %c0_4 = arith.constant 0 : index
    %2 = vector.load %arg2[%c0_2, %c0_3, %c0_4] : memref<1x128x4xf32, #tpu.memory_space<vmem>>, vector<1x128x4xf32>
    %3 = vector.shape_cast %2 : vector<1x128x4xf32> to vector<128x4xf32>
    %c0_5 = arith.constant 0 : index
    %c0_6 = arith.constant 0 : index
    %c0_7 = arith.constant 0 : index
    %4 = vector.load %arg3[%c0_5, %c0_6, %c0_7] : memref<1x4x128xf32, #tpu.memory_space<vmem>>, vector<1x4x128xf32>
    %5 = vector.shape_cast %4 : vector<1x4x128xf32> to vector<4x128xf32>
    %c0_8 = arith.constant 0 : index
    %c0_9 = arith.constant 0 : index
    %c0_10 = arith.constant 0 : index
    %c0_11 = arith.constant 0 : index
    %6 = vector.load %arg4[%c0_8, %c0_9, %c0_10, %c0_11] : memref<1x4x4x32xf32, #tpu.memory_space<vmem>>, vector<1x4x4x32xf32>
    %7 = vector.shape_cast %6 : vector<1x4x4x32xf32> to vector<4x4x32xf32>
    %c0_12 = arith.constant 0 : index
    %c0_13 = arith.constant 0 : index
    %c0_14 = arith.constant 0 : index
    %8 = vector.load %arg5[%c0_12, %c0_13, %c0_14] : memref<1x16x128xf32, #tpu.memory_space<vmem>>, vector<1x16x128xf32>
    %9 = vector.shape_cast %8 : vector<1x16x128xf32> to vector<16x128xf32>
    %c0_15 = arith.constant 0 : index
    %c0_16 = arith.constant 0 : index
    %c0_17 = arith.constant 0 : index
    %c0_18 = arith.constant 0 : index
    %10 = vector.load %arg6[%c0_15, %c0_16, %c0_17, %c0_18] : memref<1x16x4x32xf32, #tpu.memory_space<vmem>>, vector<1x16x4x32xf32>
    %11 = vector.shape_cast %10 : vector<1x16x4x32xf32> to vector<16x4x32xf32>
    %c0_19 = arith.constant 0 : index
    %c0_20 = arith.constant 0 : index
    %c0_21 = arith.constant 0 : index
    %12 = vector.load %arg7[%c0_19, %c0_20, %c0_21] : memref<1x8x4xf32, #tpu.memory_space<vmem>>, vector<1x8x4xf32>
    %13 = vector.shape_cast %12 : vector<1x8x4xf32> to vector<8x4xf32>
    %cst = arith.constant dense<0.000000e+00> : vector<16x4xf32>
    %14 = tpu.matmul %9, %3, %cst {dimension_numbers = #tpu.dot_dimension_numbers<[1], [0], [0], [1], [0, 0, 1, 1], [], []>} : vector<16x128xf32>, vector<128x4xf32>, vector<16x4xf32> -> vector<16x4xf32>
    %cst_22 = arith.constant 0.176776692 : f32
    %15 = vector.broadcast %cst_22 : f32 to vector<16x4xf32>
    %16 = arith.mulf %14, %15 : vector<16x4xf32>
    %cst_23 = arith.constant 0.000000e+00 : f32
    %17 = vector.broadcast %cst_23 : f32 to vector<16x4xf32>
    %18 = arith.cmpf oeq, %16, %17 : vector<16x4xf32>
    %cst_24 = arith.constant -1.000000e+04 : f32
    %19 = vector.broadcast %cst_24 : f32 to vector<16x4xf32>
    %20 = arith.select %18, %19, %16 : vector<16x4xi1>, vector<16x4xf32>
    %cst_25 = arith.constant 0.000000e+00 : f32
    %21 = vector.broadcast %cst_25 : f32 to vector<16x4xf32>
    %22 = arith.cmpf ogt, %20, %21 : vector<16x4xf32>
    %cst_26 = arith.constant 0.00999999977 : f32
    %23 = vector.broadcast %cst_26 : f32 to vector<16x4xf32>
    %24 = arith.mulf %23, %20 : vector<16x4xf32>
    %25 = arith.select %22, %20, %24 : vector<16x4xi1>, vector<16x4xf32>
    %cst_27 = arith.constant dense<0xFF800000> : vector<16xf32>
    %26 = vector.multi_reduction <maximumf>, %25, %cst_27 [1] : vector<16x4xf32> to vector<16xf32>
    %27 = vector.shape_cast %26 : vector<16xf32> to vector<16x1xf32>
    %28 = vector.broadcast %27 : vector<16x1xf32> to vector<16x4xf32>
    %29 = arith.subf %25, %28 : vector<16x4xf32>
    %30 = math.exp %29 : vector<16x4xf32>
    %cst_28 = arith.constant dense<0.000000e+00> : vector<16xf32>
    %31 = vector.multi_reduction <add>, %30, %cst_28 [1] : vector<16x4xf32> to vector<16xf32>
    %32 = vector.shape_cast %31 : vector<16xf32> to vector<16x1xf32>
    %33 = vector.broadcast %32 : vector<16x1xf32> to vector<16x4xf32>
    %34 = arith.divf %30, %33 : vector<16x4xf32>
    %cst_29 = arith.constant 2.500000e-01 : f32
    %35 = vector.broadcast %cst_29 : f32 to vector<16x4xf32>
    %36 = arith.cmpf oeq, %34, %35 : vector<16x4xf32>
    %cst_30 = arith.constant 0.000000e+00 : f32
    %37 = vector.broadcast %cst_30 : f32 to vector<16x4xf32>
    %38 = arith.select %36, %37, %34 : vector<16x4xi1>, vector<16x4xf32>
    %39 = vector.shape_cast %38 : vector<16x4xf32> to vector<16x1x4xf32>
    "tpu.trace_start"() <{level = 10 : i32, message = "rqn,rnd->rqd"}> : () -> ()
    %cst_31 = arith.constant dense<0.000000e+00> : vector<16x1x32xf32>
    %40 = tpu.matmul %39, %11, %cst_31 {dimension_numbers = #tpu.dot_dimension_numbers<[2], [1], [1], [2], [0, 0, 0, 1, 1, 2], [0], [0]>} : vector<16x1x4xf32>, vector<16x4x32xf32>, vector<16x1x32xf32> -> vector<16x1x32xf32>
    "tpu.trace_stop"() : () -> ()
    %41 = vector.shape_cast %40 : vector<16x1x32xf32> to vector<4x4x32xf32>
    %cst_32 = arith.constant dense<0.000000e+00> : vector<4x4xf32>
    %42 = tpu.matmul %5, %1, %cst_32 {dimension_numbers = #tpu.dot_dimension_numbers<[1], [0], [0], [1], [0, 0, 1, 1], [], []>} : vector<4x128xf32>, vector<128x4xf32>, vector<4x4xf32> -> vector<4x4xf32>
    %cst_33 = arith.constant 0.176776692 : f32
    %43 = vector.broadcast %cst_33 : f32 to vector<4x4xf32>
    %44 = arith.mulf %42, %43 : vector<4x4xf32>
    %cst_34 = arith.constant 0.000000e+00 : f32
    %45 = vector.broadcast %cst_34 : f32 to vector<4x4xf32>
    %46 = arith.cmpf oeq, %44, %45 : vector<4x4xf32>
    %cst_35 = arith.constant -1.000000e+04 : f32
    %47 = vector.broadcast %cst_35 : f32 to vector<4x4xf32>
    %48 = arith.select %46, %47, %44 : vector<4x4xi1>, vector<4x4xf32>
    %cst_36 = arith.constant 0.000000e+00 : f32
    %49 = vector.broadcast %cst_36 : f32 to vector<4x4xf32>
    %50 = arith.cmpf ogt, %48, %49 : vector<4x4xf32>
    %cst_37 = arith.constant 0.00999999977 : f32
    %51 = vector.broadcast %cst_37 : f32 to vector<4x4xf32>
    %52 = arith.mulf %51, %48 : vector<4x4xf32>
    %53 = arith.select %50, %48, %52 : vector<4x4xi1>, vector<4x4xf32>
    %cst_38 = arith.constant dense<0xFF800000> : vector<4xf32>
    %54 = vector.multi_reduction <maximumf>, %53, %cst_38 [1] : vector<4x4xf32> to vector<4xf32>
    %55 = vector.shape_cast %54 : vector<4xf32> to vector<4x1xf32>
    %56 = vector.broadcast %55 : vector<4x1xf32> to vector<4x4xf32>
    %57 = arith.subf %53, %56 : vector<4x4xf32>
    %58 = math.exp %57 : vector<4x4xf32>
    %cst_39 = arith.constant dense<0.000000e+00> : vector<4xf32>
    %59 = vector.multi_reduction <add>, %58, %cst_39 [1] : vector<4x4xf32> to vector<4xf32>
    %60 = vector.shape_cast %59 : vector<4xf32> to vector<4x1xf32>
    %61 = vector.broadcast %60 : vector<4x1xf32> to vector<4x4xf32>
    %62 = arith.divf %58, %61 : vector<4x4xf32>
    %cst_40 = arith.constant 2.500000e-01 : f32
    %63 = vector.broadcast %cst_40 : f32 to vector<4x4xf32>
    %64 = arith.cmpf oeq, %62, %63 : vector<4x4xf32>
    %cst_41 = arith.constant 0.000000e+00 : f32
    %65 = vector.broadcast %cst_41 : f32 to vector<4x4xf32>
    %66 = arith.select %64, %65, %62 : vector<4x4xi1>, vector<4x4xf32>
    %67 = tpu.concatenate %7, %41 in 2 : vector<4x4x32xf32>, vector<4x4x32xf32> -> vector<4x4x64xf32>
    %68 = vector.shape_cast %66 : vector<4x4xf32> to vector<4x1x4xf32>
    "tpu.trace_start"() <{level = 10 : i32, message = "eqn,enf->eqf"}> : () -> ()
    %cst_42 = arith.constant dense<0.000000e+00> : vector<4x1x64xf32>
    %69 = tpu.matmul %68, %67, %cst_42 {dimension_numbers = #tpu.dot_dimension_numbers<[2], [1], [1], [2], [0, 0, 0, 1, 1, 2], [0], [0]>} : vector<4x1x4xf32>, vector<4x4x64xf32>, vector<4x1x64xf32> -> vector<4x1x64xf32>
    "tpu.trace_stop"() : () -> ()
    %70 = vector.shape_cast %69 : vector<4x1x64xf32> to vector<4x64xf32>
    %cst_43 = arith.constant dense<0.000000e+00> : vector<8x64xf32>
    %71 = tpu.matmul %13, %70, %cst_43 {dimension_numbers = #tpu.dot_dimension_numbers<[1], [0], [0], [1], [0, 0, 1, 1], [], []>} : vector<8x4xf32>, vector<4x64xf32>, vector<8x64xf32> -> vector<8x64xf32>
    %c0_44 = arith.constant 0 : index
    %c0_45 = arith.constant 0 : index
    %c0_46 = arith.constant 0 : index
    %72 = vector.load %arg8[%c0_44, %c0_45, %c0_46] : memref<1x8x64xf32, #tpu.memory_space<vmem>>, vector<1x8x64xf32>
    %73 = vector.shape_cast %72 : vector<1x8x64xf32> to vector<8x64xf32>
    %74 = vector.shape_cast %71 : vector<8x64xf32> to vector<1x8x64xf32>
    tpu.vector_store %arg8[%c0_44, %c0_45, %c0_46], %74 {strides = array<i32>} : memref<1x8x64xf32, #tpu.memory_space<vmem>>, vector<1x8x64xf32>,
    return
  }
  func.func @transform_0(%arg0: i32) -> (i32, i32, i32) {
    %c0_i32 = arith.constant 0 : i32
    %c0_i32_0 = arith.constant 0 : i32
    %c0_i32_1 = arith.constant 0 : i32
    return %arg0, %c0_i32, %c0_i32_0 : i32, i32, i32
  }
  func.func @transform_1(%arg0: i32) -> (i32, i32, i32) {
    %c0_i32 = arith.constant 0 : i32
    %c0_i32_0 = arith.constant 0 : i32
    %c0_i32_1 = arith.constant 0 : i32
    return %arg0, %c0_i32, %c0_i32_0 : i32, i32, i32
  }
  func.func @transform_2(%arg0: i32) -> (i32, i32, i32) {
    %c0_i32 = arith.constant 0 : i32
    %c0_i32_0 = arith.constant 0 : i32
    %c0_i32_1 = arith.constant 0 : i32
    return %arg0, %c0_i32, %c0_i32_0 : i32, i32, i32
  }
  func.func @transform_3(%arg0: i32) -> (i32, i32, i32, i32) {
    %c0_i32 = arith.constant 0 : i32
    %c0_i32_0 = arith.constant 0 : i32
    %c0_i32_1 = arith.constant 0 : i32
    %c0_i32_2 = arith.constant 0 : i32
    return %arg0, %c0_i32, %c0_i32_0, %c0_i32_1 : i32, i32, i32, i32
  }
  func.func @transform_4(%arg0: i32) -> (i32, i32, i32) {
    %c0_i32 = arith.constant 0 : i32
    %c0_i32_0 = arith.constant 0 : i32
    %c0_i32_1 = arith.constant 0 : i32
    return %arg0, %c0_i32, %c0_i32_0 : i32, i32, i32
  }
  func.func @transform_5(%arg0: i32) -> (i32, i32, i32, i32) {
    %c0_i32 = arith.constant 0 : i32
    %c0_i32_0 = arith.constant 0 : i32
    %c0_i32_1 = arith.constant 0 : i32
    %c0_i32_2 = arith.constant 0 : i32
    return %arg0, %c0_i32, %c0_i32_0, %c0_i32_1 : i32, i32, i32, i32
  }
  func.func @transform_6(%arg0: i32) -> (i32, i32, i32) {
    %c0_i32 = arith.constant 0 : i32
    %c0_i32_0 = arith.constant 0 : i32
    %c0_i32_1 = arith.constant 0 : i32
    return %arg0, %c0_i32, %c0_i32_0 : i32, i32, i32
  }
  func.func @transform_7(%arg0: i32) -> (i32, i32, i32) {
    %c0_i32 = arith.constant 0 : i32
    %c0_i32_0 = arith.constant 0 : i32
    %c0_i32_1 = arith.constant 0 : i32
    return %arg0, %c0_i32, %c0_i32_0 : i32, i32, i32
  }
}

</mosaic_0001>

<bundles_post_ra>
// kernel: tpu_custom_call.1
= control target key start
LH: loop header
LB: loop body
LE: loop exit
PB: predicated region body
PF: predicated region fallthrough
CT: control target
= control target key end

     0   :  { %12 = vsyncpa [#allocation3], 0  ;;  %s3467_s0 = inlined_call_operand.vmem [shape: f32[2,128,4], index: 0, kind: input, shape index: {}]   ;;  %s3468_s1 = inlined_call_operand.vmem [shape: f32[2,128,4], index: 1, kind: input, shape index: {}]   ;;  %s3469_s2 = inlined_call_operand.vmem [shape: f32[2,4,128], index: 2, kind: input, shape index: {}]   ;;  %s3470_s3 = inlined_call_operand.vmem [shape: f32[2,4,4,32], index: 3, kind: input, shape index: {}]   ;;  %s3471_s4 = inlined_call_operand.vmem [shape: f32[2,16,128], index: 4, kind: input, shape index: {}]   ;;  %s3472_s5 = inlined_call_operand.vmem [shape: f32[2,16,4,32], index: 5, kind: input, shape index: {}]   ;;  %s3473_s6 = inlined_call_operand.vmem [shape: f32[2,8,4], index: 6, kind: input, shape index: {}]   ;;  %s3474_s7 = inlined_call_operand.hbm [shape: f32[2,8,64], index: 7, kind: output, shape index: {}]  }
   0x1   :  { %14 = vsyncpa [#allocation3 + $0x1], 0  ;;  %s3111_s24 = smov 0   ;;  %s3113_s25 = smov 0  }
   0x2   :  { %s3115_s26 = smov 0   ;;  %s3117_s27 = smov 0  }
   0x3 LB: > { %s3132_s28 = sadd.s32 4294967295, %s3063_s27   ;;  %s2569_s29 = sadd.s32 4294967294, %s3063_s27   ;;  %s3063_s27 = sphi %s3117_s27, %s3480_s27   ;;  %s3059_s26 = sphi %s3115_s26, %s3479_s26   ;;  %s3055_s25 = sphi %s3113_s25, %s3478_s25   ;;  %s3051_s24 = sphi %s3111_s24, %s3477_s24  }
   0x4   : > { %s3136_s30 = sadd.s32 1, %s3063_s27   ;;  %s209_s8 = sadd.s32 1, %s3059_s26 }
   0x5   : > { %s206_s9 = ssub.s32 %s3063_s27, %s3136_s30  ;;  %p219_p0 = scmp.ne.s32.totalorder %s3059_s26, %s3055_s25 }
   0x6   : > { %p207_p1 = scmp.eq.s32.totalorder %s206_s9, 0  ;;  %p220_p2 = scmp.eq.s32.totalorder %s3132_s28, 1 }
   0x7   : > { %p225_p3 = scmp.ne.s32.totalorder %s3055_s25, %s3051_s24  ;;  %p226_p4 = scmp.eq.s32.totalorder %s2569_s29, 1 }
   0x8   : > { %s3147_s10 = scalar_select %p207_p1, %s3059_s26, %s209_s8  }
   0x9   : > { %p3149_p5 = por %p220_p2, %p219_p0  ;;  %p3153_p6 = por %p226_p4, %p225_p3 }
   0xa   : > { %p2572_p7 = scmp.ge.s32.totalorder %s3063_s27, 1  ;;  %p298_p8 = scmp.lt.s32.totalorder %s3063_s27, 3 }
   0xc   : > { %p299_p9 = pnand %p2572_p7, %p298_p8 }
   0xd   : > { %p358_p10 = scmp.lt.s32.totalorder (!%p299_p9), %s3132_s28, 1  ;;  %vm534_vm3 = vcmask (!%p299_p9), 31744   ;;  %v3065_v48 = vmov (!%p299_p9), 0.0   ;;  %vm663_vm5 = vcmask (!%p299_p9), 1043456   ;;  %vm3066_vm6 = vmmov (!%p299_p9), 0  }
   0xe   : > { %302 = sbr.rel (%p299_p9) target bundleno = 1667 (0x683), region = 48  ;;  %2754 = vmatprep.subr.mxu1 (!%p299_p9), %v3065_v48  ;;  %2756 = vmatprep.mubr.msk.f32.mxu1 (!%p299_p9), %vm3066_vm6, %v3065_v48  ;;  %v3067_v52 = vmov (!%p299_p9), 1966171168   ;;  %v567_v54 = vlaneseq (!%p299_p9)  ;;  %vm1969_vm9 = vcmask (!%p299_p9), 1041409   ;;  %vm1972_vm10 = vcmask (!%p299_p9), 1042434  }
   0xf   : > { %v565_v53 = vunpack.c.l.s4 (!%p299_p9), %v3067_v52  ;;  %vm1975_vm11 = vcmask (!%p299_p9), 1043459   ;;  %vm1938_vm14 = vcmask (!%p299_p9), 27648   ;;  %vm2007_vm15 = vcmask (!%p299_p9), 261120  }
  0x10   : > { %v568_v57 = vshrl.u32 (!%p299_p9), %v567_v54, 7 }
  0x11   : > { %v566_v56 = vunpack.c.0.s8 (!%p299_p9), %v565_v53 }
  0x13   : > { %v3219_v60 = vsub.s32 (!%p299_p9), %v566_v56, %v568_v57 }
  0x15   : > { %s3161_s13 = scalar_select %p358_p10, %s3132_s28, 1 }
  0x17   : > { %s2632_s14 = sshll.u32 %s3161_s13, 7  ;;  %s2634_s18 = sshll.u32 %s3161_s13, 4 }
  0x18   : > { %s3169_s17 = scalar_lea.vmem %s3468_s1, %s2632_s14  ;;  %s3183_s21 = scalar_lea.vmem %s3471_s4, %s2634_s18 }
  0x19   : > { %v407_v0 = vld [vmem:[%s3169_s17] sm:$0xff]  ;;  %v408_v1 = vld [vmem:[%s3169_s17 + $0x8] sm:$0xff]  ;;  %v409_v2 = vld [vmem:[%s3169_s17 + $0x10] sm:$0xff]  ;;  %s2636_s22 = sshll.u32 %s3161_s13, 6  ;;  %s3322_s16 = scalar_lea.vmem %s3467_s0, %s2632_s14 }
  0x1a   : > { %v2889_v3 = vpack.c.bf16 %v408_v1, %v407_v0  ;;  %v410_v4 = vld [vmem:[%s3169_s17 + $0x18] sm:$0xff]  ;;  %v411_v6 = vld [vmem:[%s3169_s17 + $0x20] sm:$0xff]  ;;  %v412_v7 = vld [vmem:[%s3169_s17 + $0x28] sm:$0xff]  ;;  %s3205_s8 = scalar_lea.vmem %s3472_s5, %s2636_s22  ;;  %s2578_s14 = sshll.u32 %s3161_s13, 2 }
  0x1b   : > { %v2893_v5 = vpack.c.bf16 %v410_v4, %v409_v2  ;;  %v2897_v8 = vpack.c.bf16 %v412_v7, %v411_v6  ;;  %v428_v9 = vld [vmem:[%s3183_s21] sm:$0xff]  ;;  %v413_v10 = vld [vmem:[%s3169_s17 + $0x30] sm:$0xff]  ;;  %v414_v11 = vld [vmem:[%s3169_s17 + $0x38] sm:$0xff]  ;;  %s371_s20 = scalar_lea.vmem %s3469_s2, %s2578_s14  ;;  %s3377_s29 = scalar_lea.vmem %s3470_s3, %s2634_s18 }
  0x1c   : > { %2890 = vmatprep.subr.bf16.mxu0 %v2889_v3  ;;  %2746 = vmatprep.mubr.f32.mxu0 %v428_v9  ;;  %v2901_v12 = vpack.c.bf16 %v414_v11, %v413_v10  ;;  %v415_v13 = vld [vmem:[%s3169_s17 + $0x40] sm:$0xff]  ;;  %v416_v14 = vld [vmem:[%s3169_s17 + $0x48] sm:$0xff]  ;;  %v417_v16 = vld [vmem:[%s3169_s17 + $0x50] sm:$0xff]  ;;  %s2585_s18 = sshll.u32 %s3161_s13, 3  ;;  %s355_s13 = sand.u32 1, %s3055_s25  }
  0x1d   : > { %2892 = vmatpush3.bf16.msra.mxu0 %v2889_v3  ;;  %v2905_v15 = vpack.c.bf16 %v416_v14, %v415_v13  ;;  %v418_v17 = vld [vmem:[%s3169_s17 + $0x58] sm:$0xff]  ;;  %v419_v19 = vld [vmem:[%s3169_s17 + $0x60] sm:$0xff]  ;;  %v420_v20 = vld [vmem:[%s3169_s17 + $0x68] sm:$0xff]  ;;  %s390_s15 = scalar_lea.vmem %s3473_s6, %s2585_s18  ;;  %s2629_s14 = sshll.u32 %s3132_s28, 7 }
  0x1e   : > { %2894 = vmatprep.subr.bf16.mxu0 %v2893_v5  ;;  %v2909_v18 = vpack.c.bf16 %v418_v17, %v417_v16  ;;  %v2913_v21 = vpack.c.bf16 %v420_v20, %v419_v19  ;;  %v421_v22 = vld [vmem:[%s3169_s17 + $0x70] sm:$0xff]  ;;  %v422_v23 = vld [vmem:[%s3169_s17 + $0x78] sm:$0xff]  ;;  %v429_v25 = vld [vmem:[%s3183_s21 + $0x8] sm:$0xff]  ;;  %s3069_s21 = smov 32   ;;  %s3425_s22 = scalar_lea.hbm %s3474_s7, %s2629_s14 }
  0x1f   : > { %v2917_v24 = vpack.c.bf16 %v422_v23, %v421_v22  ;;  %v430_v49 = vld [vmem:[%s3205_s8] sm:$0xf]  ;;  %v431_v50 = vld [vmem:[%s3205_s8 + $0x4] sm:$0xf]  ;;  %v433_v13 = vld [vmem:[%s3205_s8 + $0xc] sm:$0xf] }
  0x20   : > { %2755 = vmatpush3.msk.msra.mxu1 %vm663_vm5, %v431_v50  ;;  %v439_v3 = vld [vmem:[%s3205_s8 + $0x24] sm:$0xf]  ;;  %v434_v19 = vld [vmem:[%s3205_s8 + $0x10] sm:$0xf]  ;;  %v396_v50 = vld [vmem:[%s3322_s16 + $0x28] sm:$0xff]  ;;  %s2425_s23 = scalar_lea.sflag [#allocation3], %s355_s13 }
  0x21   : > { %2896 = vmatpush3.bf16.msra.mxu0 %v2893_v5  ;;  %2759 = vmatprep.subr.mxu1 %v3065_v48  ;;  %v397_v52 = vld [vmem:[%s3322_s16 + $0x30] sm:$0xff]  ;;  %v398_v53 = vld [vmem:[%s3322_s16 + $0x38] sm:$0xff]  ;;  %v400_v56 = vld [vmem:[%s3322_s16 + $0x48] sm:$0xff]  ;;  %s3070_s28 = smov [#allocation2]  }
  0x22   : > { %2898 = vmatprep.subr.bf16.mxu0 %v2897_v8  ;;  %v2931_v54 = vpack.c.bf16 %v398_v53, %v397_v52  ;;  %s3005_s18 = sshll.u32 %s3070_s28, 4  ;;  %s3006_s18 = int_to_ptr.vmem [resolvable:$false] %s3005_s18 }
  0x25   : > { %2900 = vmatpush3.bf16.msra.mxu0 %v2897_v8  ;;  %v432_v8 = vld [vmem:[%s3205_s8 + $0x8] sm:$0xf] }
  0x26   : > { %2902 = vmatprep.subr.bf16.mxu0 %v2901_v12 }
  0x29   : > { %2904 = vmatpush3.bf16.msra.mxu0 %v2901_v12 }
  0x2a   : > { %2906 = vmatprep.subr.bf16.mxu0 %v2905_v15 }
  0x2d   : > { %2908 = vmatpush3.bf16.msra.mxu0 %v2905_v15  ;;  %v441_v15 = vld [vmem:[%s3205_s8 + $0x2c] sm:$0xf] }
  0x2e   : > { %2910 = vmatprep.subr.bf16.mxu0 %v2909_v18 }
  0x31   : > { %2912 = vmatpush3.bf16.msra.mxu0 %v2909_v18 }
  0x32   : > { %2914 = vmatprep.subr.bf16.mxu0 %v2913_v21 }
  0x35   : > { %2916 = vmatpush3.bf16.msra.mxu0 %v2913_v21  ;;  %v443_v21 = vld [vmem:[%s3205_s8 + $0x34] sm:$0xf] }
  0x36   : > { %2918 = vmatprep.subr.bf16.mxu0 %v2917_v24 }
  0x39   : > { %2920 = vmatpush3.bf16.msra.mxu0 %v2917_v24  ;;  %v435_v24 = vld [vmem:[%s3205_s8 + $0x14] sm:$0xf] }
  0x3a   : > { %2749 = vmatprep.subr.mxu0 %v3065_v48 }
  0x3c   : > { %2747 = vmatmul.mubr.f32.vlgmr.msra.gmra.mrb[0].mxu0 %v429_v25 }
  0x3d   : > { %2750 = vmatpush3.msk.msra.mxu0 %vm663_vm5, %v430_v49  ;;  %2751 = vmatprep.mubr.msk.f32.mxu0 %vm3066_vm6, %v3065_v48  ;;  %v395_v49 = vld [vmem:[%s3322_s16 + $0x20] sm:$0xff] }
  0x3e   : > { %2794 = vmatprep.subr.mxu0 %v3065_v48 }
 0x10f   : > { %v2748_v26 = vpop.f32.mrb[0].mxu0 }
 0x110   : > { %v523_v27 = vmul.f32 0.17677669, %v2748_v26  ;;  %v513_v28 = vpop.f32.mrb[1].mxu0  ;;  %v445_v26 = vld [vmem:[%s3205_s8 + $0x3c] sm:$0xf] }
 0x111   : > { %v522_v29 = vmul.f32 0.17677669, %v513_v28 }
 0x112   : > { %vm525_vm0 = vcmp.eq.f32.partialorder %v523_v27, 0.0 }
 0x113   : > { %v527_v30 = vsel %vm525_vm0, -10000.0, %v523_v27  ;;  %vm524_vm1 = vcmp.eq.f32.partialorder %v522_v29, 0.0 }
 0x114   : > { %v526_v31 = vsel %vm524_vm1, -10000.0, %v522_v29  ;;  %v531_v32 = vmul.f32 0.01, %v527_v30  ;;  %vm529_vm4 = vcmp.gt.f32.partialorder %v527_v30, 0.0  ;;  %v436_v29 = vld [vmem:[%s3205_s8 + $0x18] sm:$0xf] }
 0x115   : > { %v530_v33 = vmul.f32 0.01, %v526_v31  ;;  %vm528_vm2 = vcmp.gt.f32.partialorder %v526_v31, 0.0  ;;  %vm2422_vm1 = vcmask 523264  }
 0x116   : > { %v533_v36 = vsel %vm529_vm4, %v527_v30, %v531_v32 }
 0x117   : > { %v532_v34 = vsel %vm528_vm2, %v526_v31, %v530_v33  ;;  %v538_v37 = vsel %vm534_vm3, %v533_v36, -inf  ;;  %v437_v31 = vld [vmem:[%s3205_s8 + $0x1c] sm:$0xf]  ;;  %v438_v33 = vld [vmem:[%s3205_s8 + $0x20] sm:$0xf] }
 0x118   : > { %v535_v35 = vsel %vm534_vm3, %v532_v34, -inf }
 0x119   : > { %536 = vmax.xlane.f32.xlu0 %v535_v35  ;;  %v440_v35 = vld [vmem:[%s3205_s8 + $0x28] sm:$0xf] }
 0x11d   : > { %539 = vmax.xlane.f32.xlu0 %v538_v37  ;;  %v442_v37 = vld [vmem:[%s3205_s8 + $0x30] sm:$0xf] }
 0x1a6   : > { %v537_v38 = vpop.xlane.xlu0 %536 }
 0x1a7   : > { %v541_v39 = vsub.f32 %v532_v34, %v537_v38 }
 0x1a9   : > { %v543_v40 = vmul.f32 1.442695, %v541_v39  ;;  %v444_v39 = vld [vmem:[%s3205_s8 + $0x38] sm:$0xf]  ;;  %s3007_s8 = scalar_lea.vmem %s3006_s18, 256 }
 0x1aa   : > { %v540_v41 = vpop.xlane.xlu0 %539 }
 0x1ab   : > { %2989 = vpow2.f32 %v543_v40  ;;  %v542_v42 = vsub.f32 %v533_v36, %v540_v41  ;;  %v391_v40 = vld [vmem:[%s3322_s16] sm:$0xff]  ;;  %v392_v41 = vld [vmem:[%s3322_s16 + $0x8] sm:$0xff] }
 0x1ad   : > { %v545_v43 = vmul.f32 1.442695, %v542_v42  ;;  %v2922_v42 = vpack.c.bf16 %v392_v41, %v391_v40 }
 0x1af   : > { %2991 = vpow2.f32 %v545_v43  ;;  %v3068_v43 = vmov 0.0|0.0  }
 0x1b5   : > { %v2990_v44 = vpop.eup %2989 }
 0x1b6   : > { %v547_v45 = vsel %vm534_vm3, %v2990_v44, 0.0 }
 0x1b7   : > { %548 = vadd.xlane.f32.xlu1 %v547_v45  ;;  %v393_v45 = vld [vmem:[%s3322_s16 + $0x10] sm:$0xff] }
 0x1b9   : > { %v2992_v46 = vpop.eup %2991 }
 0x1ba   : > { %v550_v47 = vsel %vm534_vm3, %v2992_v46, 0.0 }
 0x1bb   : > { %551 = vadd.xlane.f32.xlu1 %v550_v47 }
 0x244   : > { %v549_v51 = vpop.xlane.xlu1 %548 }
 0x245   : > { %2993 = vrcp.f32 %v549_v51  ;;  %v2928_v51 = vpack.c.bf16 %v396_v50, %v395_v49 }
 0x248   : > { %v552_v55 = vpop.xlane.xlu1 %551 }
 0x249   : > { %2995 = vrcp.f32 %v552_v55  ;;  %v399_v55 = vld [vmem:[%s3322_s16 + $0x40] sm:$0xff] }
 0x24a   : > { %v2934_v57 = vpack.c.bf16 %v400_v56, %v399_v55 }
 0x24f   : > { %v2994_v58 = vpop.eup %2993 }
 0x250   : > { %v554_v59 = vmul.f32 %v2994_v58, %v2990_v44  ;;  %v401_v58 = vld [vmem:[%s3322_s16 + $0x50] sm:$0xff] }
 0x252   : > { %vm557_vm7 = vcmp.eq.f32.partialorder %v554_v59, 0.25 }
 0x253   : > { %v2996_v61 = vpop.eup %2995  ;;  %v559_v62 = vsel %vm557_vm7, 0.0, %v554_v59  ;;  %v402_v59 = vld [vmem:[%s3322_s16 + $0x58] sm:$0xff] }
 0x254   : > { %v556_v63 = vmul.f32 %v2996_v61, %v2992_v46  ;;  %v570_v0 = vrot.slane %v559_v62, %v3219_v60  ;;  %v563_v10 = vcombine.high %v559_v62, %v559_v62  ;;  %v394_v46 = vld [vmem:[%s3322_s16 + $0x18] sm:$0xff]  ;;  %v2937_v61 = vpack.c.bf16 %v402_v59, %v401_v58  ;;  %v403_v62 = vld [vmem:[%s3322_s16 + $0x60] sm:$0xff] }
 0x255   : > { %v2925_v47 = vpack.c.bf16 %v394_v46, %v393_v45 }
 0x256   : > { %vm558_vm8 = vcmp.eq.f32.partialorder %v556_v63, 0.25  ;;  %v586_v1 = vrot.slane %v570_v0, %v3219_v60  ;;  %v578_v2 = vcombine.high %v570_v0, %v570_v0  ;;  %v577_v16 = vrot.slane %v563_v10, %v3219_v60 }
 0x257   : > { %v560_v4 = vsel %vm558_vm8, 0.0, %v556_v63  ;;  %v404_v63 = vld [vmem:[%s3322_s16 + $0x68] sm:$0xff] }
 0x258   : > { %v612_v5 = vcombine.high %v560_v4, %v560_v4  ;;  %v3225_v6 = vrot.slane %v560_v4, %v3219_v60  ;;  %2752 = vmatmul.mubr.msk.f32.vlgmr.msra.gmra.mrb[2].mxu0 %vm534_vm3, %v586_v1  ;;  %v600_v7 = vrot.slane %v578_v2, %v3219_v60  ;;  %v608_v11 = vcombine.high %v586_v1, %v586_v1  ;;  %v405_v1 = vld [vmem:[%s3322_s16 + $0x70] sm:$0xff]  ;;  %v406_v2 = vld [vmem:[%s3322_s16 + $0x78] sm:$0xff]  ;;  %v423_v4 = vld [vmem:[%s371_s20] sm:$0xf]  ;;  %s2573_s16 = sshll.u32 %s355_s13, 3 }
 0x259   : > { %2795 = vmatpush3.msk.msra.mxu0 %vm663_vm5, %v439_v3  ;;  %2796 = vmatprep.mubr.msk.f32.mxu0 %vm3066_vm6, %v3065_v48  ;;  %v593_v22 = vrot.slane %v577_v16, %v3219_v60  ;;  %v579_v25 = vcombine.high %v577_v16, %v577_v16  ;;  %v2940_v0 = vpack.c.bf16 %v404_v63, %v403_v62  ;;  %s357_s17 = scalar_lea.vmem [#allocation2], %s2573_s16 }
 0x25a   : > { %2757 = vmatmul.mubr.msk.f32.vlgmr.msra.gmra.mrb[0].mxu1 %vm534_vm3, %v600_v7  ;;  %v627_v9 = vcombine.high %v3225_v6, %v3225_v6  ;;  %2804 = vmatprep.subr.mxu0 %v3065_v48  ;;  %v3244_v14 = vrot.slane %v612_v5, %v3219_v60  ;;  %v610_v17 = vcombine.high %v600_v7, %v600_v7  ;;  %s2438_s19 = sshll.u32 %s357_s17, 4  ;;  %s3427_s19 = int_to_ptr.vmem [resolvable:$true] %s2438_s19 }
 0x25b   : > { %2760 = vmatpush3.msk.msra.mxu1 %vm663_vm5, %v432_v8  ;;  %2761 = vmatprep.mubr.msk.f32.mxu1 %vm3066_vm6, %v3065_v48  ;;  %v607_v27 = vrot.slane %v579_v25, %v3219_v60  ;;  %v609_v30 = vcombine.high %v593_v22, %v593_v22  ;;  %v635_v34 = vrot.slane %v3225_v6, %v3219_v60  ;;  %p3008_p0 = scmp.lt.s32.totalorder %s3427_s19, %s3006_s18 }
 0x25c   : > { %v649_v12 = vrot.slane %v627_v9, %v3219_v60  ;;  %2764 = vmatprep.subr.mxu1 %v3065_v48  ;;  %v628_v20 = vcombine.high %v3244_v14, %v3244_v14  ;;  %v642_v38 = vrot.slane %v3244_v14, %v3219_v60  ;;  %v2943_v3 = vpack.c.bf16 %v406_v2, %v405_v1 }
 0x25d   : > { %v611_v32 = vcombine.high %v607_v27, %v607_v27  ;;  %v657_v36 = vcombine.high %v635_v34, %v635_v34 }
 0x25e   : > { %2762 = vmatmul.mubr.msk.f32.vlgmr.msra.gmra.mrb[2].mxu1 %vm534_vm3, %v608_v11  ;;  %2797 = vmatmul.mubr.msk.f32.vlgmr.msra.gmra.mrb[4].mxu0 %vm534_vm3, %v649_v12  ;;  %v659_v18 = vcombine.high %v649_v12, %v649_v12  ;;  %v656_v23 = vrot.slane %v628_v20, %v3219_v60  ;;  %v658_v44 = vcombine.high %v642_v38, %v642_v38 }
 0x25f   : > { %2765 = vmatpush3.msk.msra.mxu1 %vm663_vm5, %v433_v13  ;;  %2766 = vmatprep.mubr.msk.f32.mxu1 %vm3066_vm6, %v3065_v48 }
 0x260   : > { %2805 = vmatpush3.msk.msra.mxu0 %vm663_vm5, %v441_v15  ;;  %2806 = vmatprep.mubr.msk.f32.mxu0 %vm3066_vm6, %v3065_v48  ;;  %v660_v28 = vcombine.high %v656_v23, %v656_v23 }
 0x261   : > { %2769 = vmatprep.subr.mxu1 %v3065_v48  ;;  %2814 = vmatprep.subr.mxu0 %v3065_v48 }
 0x262   : > { %2767 = vmatmul.mubr.msk.f32.vlgmr.msra.gmra.mrb[4].mxu1 %vm534_vm3, %v610_v17  ;;  %2807 = vmatmul.mubr.msk.f32.vlgmr.msra.gmra.mrb[6].mxu0 %vm534_vm3, %v659_v18 }
 0x263   : > { %2770 = vmatpush3.msk.msra.mxu1 %vm663_vm5, %v434_v19  ;;  %2771 = vmatprep.mubr.msk.f32.mxu1 %vm3066_vm6, %v3065_v48 }
 0x264   : > { %2815 = vmatpush3.msk.msra.mxu0 %vm663_vm5, %v443_v21  ;;  %2816 = vmatprep.mubr.msk.f32.mxu0 %vm3066_vm6, %v3065_v48 }
 0x265   : > { %2774 = vmatprep.subr.mxu1 %v3065_v48  ;;  %2824 = vmatprep.subr.mxu0 %v3065_v48 }
 0x266   : > { %2772 = vmatmul.mubr.msk.f32.vlgmr.msra.gmra.mrb[6].mxu1 %vm534_vm3, %v593_v22  ;;  %2817 = vmatmul.mubr.msk.f32.vlgmr.msra.gmra.mrb[8].mxu0 %vm534_vm3, %v656_v23 }
 0x267   : > { %2775 = vmatpush3.msk.msra.mxu1 %vm663_vm5, %v435_v24  ;;  %2776 = vmatprep.mubr.msk.f32.mxu1 %vm3066_vm6, %v3065_v48 }
 0x268   : > { %2825 = vmatpush3.msk.msra.mxu0 %vm663_vm5, %v445_v26  ;;  %2826 = vmatprep.mubr.msk.f32.mxu0 %vm3066_vm6, %v3065_v48 }
 0x269   : > { %2779 = vmatprep.subr.mxu1 %v3065_v48  ;;  %2864 = vmatprep.subr.mxu0 %v3065_v48 }
 0x26a   : > { %2777 = vmatmul.mubr.msk.f32.vlgmr.msra.gmra.mrb[8].mxu1 %vm534_vm3, %v607_v27  ;;  %2827 = vmatmul.mubr.msk.f32.vlgmr.msra.gmra.mrb[10].mxu0 %vm534_vm3, %v660_v28 }
 0x26b   : > { %2780 = vmatpush3.msk.msra.mxu1 %vm663_vm5, %v436_v29  ;;  %2781 = vmatprep.mubr.msk.f32.mxu1 %vm3066_vm6, %v3065_v48 }
 0x26c   : > { %2784 = vmatprep.subr.mxu1 %v3065_v48  ;;  %2866 = vmatprep.mubr.msk.f32.mxu0 %vm3066_vm6, %v3065_v48 }
 0x26e   : > { %2782 = vmatmul.mubr.msk.f32.vlgmr.msra.gmra.mrb[10].mxu1 %vm534_vm3, %v609_v30 }
 0x26f   : > { %2785 = vmatpush3.msk.msra.mxu1 %vm663_vm5, %v437_v31  ;;  %2786 = vmatprep.mubr.msk.f32.mxu1 %vm3066_vm6, %v3065_v48 }
 0x270   : > { %2789 = vmatprep.subr.mxu1 %v3065_v48 }
 0x272   : > { %2787 = vmatmul.mubr.msk.f32.vlgmr.msra.gmra.mrb[12].mxu1 %vm534_vm3, %v611_v32 }
 0x273   : > { %2790 = vmatpush3.msk.msra.mxu1 %vm663_vm5, %v438_v33  ;;  %2791 = vmatprep.mubr.msk.f32.mxu1 %vm3066_vm6, %v3065_v48 }
 0x274   : > { %2799 = vmatprep.subr.mxu1 %v3065_v48 }
 0x276   : > { %2792 = vmatmul.mubr.msk.f32.vlgmr.msra.gmra.mrb[14].mxu1 %vm534_vm3, %v635_v34 }
 0x277   : > { %2800 = vmatpush3.msk.msra.mxu1 %vm663_vm5, %v440_v35  ;;  %2801 = vmatprep.mubr.msk.f32.mxu1 %vm3066_vm6, %v3065_v48 }
 0x278   : > { %2809 = vmatprep.subr.mxu1 %v3065_v48 }
 0x27a   : > { %2802 = vmatmul.mubr.msk.f32.vlgmr.msra.gmra.mrb[16].mxu1 %vm534_vm3, %v657_v36 }
 0x27b   : > { %2810 = vmatpush3.msk.msra.mxu1 %vm663_vm5, %v442_v37  ;;  %2811 = vmatprep.mubr.msk.f32.mxu1 %vm3066_vm6, %v3065_v48 }
 0x27c   : > { %2819 = vmatprep.subr.mxu1 %v3065_v48 }
 0x27e   : > { %2812 = vmatmul.mubr.msk.f32.vlgmr.msra.gmra.mrb[18].mxu1 %vm534_vm3, %v642_v38 }
 0x27f   : > { %2820 = vmatpush3.msk.msra.mxu1 %vm663_vm5, %v444_v39  ;;  %2821 = vmatprep.mubr.msk.f32.mxu1 %vm3066_vm6, %v3065_v48 }
 0x280   : > { %2921 = vmatprep.subr.bf16.mxu1 %v3068_v43 }
 0x282   : > { %2822 = vmatmul.mubr.msk.f32.vlgmr.msra.gmra.mrb[20].mxu1 %vm534_vm3, %v658_v44 }
 0x283   : > { %2923 = vmatpush3.bf16.msra.mxu1 %v2922_v42  ;;  %2861 = vmatprep.mubr.msk.f32.mxu1 %vm3066_vm6, %v3065_v48 }
 0x284   : > { %2924 = vmatprep.subr.bf16.mxu1 %v3068_v43 }
 0x287   : > { %2926 = vmatpush3.bf16.msra.mxu1 %v2925_v47 }
 0x288   : > { %2927 = vmatprep.subr.bf16.mxu1 %v3068_v43 }
 0x28b   : > { %2929 = vmatpush3.bf16.msra.mxu1 %v2928_v51 }
 0x28c   : > { %2930 = vmatprep.subr.bf16.mxu1 %v3068_v43 }
 0x28f   : > { %2932 = vmatpush3.bf16.msra.mxu1 %v2931_v54 }
 0x290   : > { %2933 = vmatprep.subr.bf16.mxu1 %v3068_v43 }
 0x293   : > { %2935 = vmatpush3.bf16.msra.mxu1 %v2934_v57 }
 0x294   : > { %2936 = vmatprep.subr.bf16.mxu1 %v3068_v43 }
 0x297   : > { %2938 = vmatpush3.bf16.msra.mxu1 %v2937_v61 }
 0x298   : > { %2939 = vmatprep.subr.bf16.mxu1 %v3068_v43 }
 0x29b   : > { %2941 = vmatpush3.bf16.msra.mxu1 %v2940_v0 }
 0x29c   : > { %2942 = vmatprep.subr.bf16.mxu1 %v3068_v43 }
 0x29f   : > { %2944 = vmatpush3.bf16.msra.mxu1 %v2943_v3 }
 0x2a2   : > { %2862 = vmatmul.mubr.f32.vlgmr.msra.gmra.mrb[22].mxu1 %v423_v4 }
 0x32b   : > { %v733_v5 = vpop.f32.mrb[2].mxu0 }
 0x32c   : > { %v2753_v6 = vpop.f32.mrb[3].mxu0 }
 0x32d   : > { %v808_v7 = vpop.f32.mrb[0].mxu1 }
 0x32e   : > { %v1968_v8 = vrot.slane %v808_v7, 7  ;;  %v2758_v9 = vpop.f32.mrb[1].mxu1 }
 0x330   : > { %v1970_v10 = vsel %vm1969_vm9, %v1968_v8, %v733_v5  ;;  %v424_v8 = vld [vmem:[%s3377_s29] sm:$0xf] }
 0x331   : > { %v883_v11 = vpop.f32.mrb[2].mxu1  ;;  %v1408_v12 = vpop.f32.mrb[4].mxu0 }
 0x332   : > { %v1971_v13 = vrot.slane %v883_v11, 6  ;;  %v2763_v14 = vpop.f32.mrb[3].mxu1  ;;  %v2798_v15 = vpop.f32.mrb[5].mxu0  ;;  %v1983_v40 = vrot.slane %v1408_v12, 7 }
 0x334   : > { %v1973_v16 = vsel %vm1972_vm10, %v1971_v13, %v1970_v10 }
 0x335   : > { %v958_v17 = vpop.f32.mrb[4].mxu1  ;;  %v1558_v18 = vpop.f32.mrb[6].mxu0 }
 0x336   : > { %v1974_v19 = vrot.slane %v958_v17, 5  ;;  %v2768_v20 = vpop.f32.mrb[5].mxu1  ;;  %v2808_v21 = vpop.f32.mrb[7].mxu0  ;;  %v1987_v49 = vrot.slane %v1558_v18, 5 }
 0x337   : > { %v425_v20 = vld [vmem:[%s3377_s29 + $0x4] sm:$0xf] }
 0x338   : > { %v1976_v22 = vsel %vm1975_vm11, %v1974_v19, %v1973_v16 }
 0x339   : > { %v1033_v23 = vpop.f32.mrb[6].mxu1  ;;  %v1708_v24 = vpop.f32.mrb[8].mxu0 }
 0x33a   : > { %v2773_v25 = vpop.f32.mrb[7].mxu1  ;;  %v2818_v26 = vpop.f32.mrb[9].mxu0  ;;  %v1989_v50 = vrot.slane %v1708_v24, 7 }
 0x33b   : > { %v426_v25 = vld [vmem:[%s3377_s29 + $0x8] sm:$0xf] }
 0x33d   : > { %v1108_v27 = vpop.f32.mrb[8].mxu1  ;;  %v1858_v28 = vpop.f32.mrb[10].mxu0 }
 0x33e   : > { %v1977_v29 = vrot.slane %v1108_v27, 7  ;;  %v2778_v30 = vpop.f32.mrb[9].mxu1  ;;  %v2828_v31 = vpop.f32.mrb[11].mxu0  ;;  %v1993_v59 = vrot.slane %v1858_v28, 5  ;;  %v427_v28 = vld [vmem:[%s3377_s29 + $0xc] sm:$0xf] }
 0x33f   : > { %s3001_s29 = scalar_lea.vmem %s3427_s19, 128 }
 0x340   : > { %v1978_v32 = vsel %vm1969_vm9, %v1977_v29, %v1033_v23  ;;  %p3002_p11 = scmp.ne.s32.totalorder %s3427_s19, %s3001_s29  ;;  %p3009_p1 = scmp.lt.s32.totalorder %s3007_s8, %s3001_s29 }
 0x341   : > { %v1183_v33 = vpop.f32.mrb[10].mxu1 }
 0x342   : > { %v1979_v34 = vrot.slane %v1183_v33, 6  ;;  %v2783_v35 = vpop.f32.mrb[11].mxu1  ;;  %p3003_p12 = pnand %p3002_p11, %p3149_p5  ;;  %p3010_p2 = por %p3009_p1, %p3008_p0 }
 0x344   : > { %v1980_v36 = vsel %vm1972_vm10, %v1979_v34, %v1978_v32  ;;  %p3004_p13 = pneg %p3003_p12 }
 0x345   : > { %v1258_v37 = vpop.f32.mrb[12].mxu1 }
 0x346   : > { %v1981_v38 = vrot.slane %v1258_v37, 5  ;;  %v2788_v39 = vpop.f32.mrb[13].mxu1  ;;  %p3011_p3 = pnand %p3010_p2, %p3004_p13 }
 0x348   : > { %v1982_v41 = vsel %vm1975_vm11, %v1981_v38, %v1980_v36 }
 0x349   : > { %v1333_v42 = vpop.f32.mrb[14].mxu1 }
 0x34a   : > { %v1984_v43 = vsel %vm1969_vm9, %v1983_v40, %v1333_v42  ;;  %v2793_v44 = vpop.f32.mrb[15].mxu1 }
 0x34b   : > { %v446_v44 = vld [vmem:[%s390_s15] sm:$0xff] }
 0x34d   : > { %v1483_v45 = vpop.f32.mrb[16].mxu1 }
 0x34e   : > { %v1985_v46 = vrot.slane %v1483_v45, 6  ;;  %v2803_v47 = vpop.f32.mrb[17].mxu1 }
 0x350   : > { %v1986_v51 = vsel %vm1972_vm10, %v1985_v46, %v1984_v43 }
 0x351   : > { %v1633_v52 = vpop.f32.mrb[18].mxu1  ;;  %v1988_v53 = vsel %vm1975_vm11, %v1987_v49, %v1986_v51 }
 0x352   : > { %v1990_v54 = vsel %vm1969_vm9, %v1989_v50, %v1633_v52  ;;  %v2813_v55 = vpop.f32.mrb[19].mxu1 }
 0x355   : > { %v1783_v56 = vpop.f32.mrb[20].mxu1 }
 0x356   : > { %v1991_v57 = vrot.slane %v1783_v56, 6  ;;  %v2823_v58 = vpop.f32.mrb[21].mxu1 }
 0x358   : > { %v1992_v61 = vsel %vm1972_vm10, %v1991_v57, %v1990_v54 }
 0x359   : > { %v1994_v62 = vsel %vm1975_vm11, %v1993_v59, %v1992_v61 }
 0x375   : > { %v1928_v63 = vpop.f32.mrb[22].mxu1 }
 0x376   : > { %v1932_v0 = vmul.f32 0.17677669, %v1928_v63  ;;  %v2863_v1 = vpop.f32.mrb[23].mxu1 }
 0x378   : > { %vm1933_vm12 = vcmp.eq.f32.partialorder %v1932_v0, 0.0 }
 0x379   : > { %v1934_v2 = vsel %vm1933_vm12, -10000.0, %v1932_v0 }
 0x37a   : > { %v1936_v3 = vmul.f32 0.01, %v1934_v2  ;;  %vm1935_vm13 = vcmp.gt.f32.partialorder %v1934_v2, 0.0 }
 0x37c   : > { %v1937_v4 = vsel %vm1935_vm13, %v1934_v2, %v1936_v3 }
 0x37d   : > { %v1939_v5 = vsel %vm1938_vm14, %v1937_v4, -inf }
 0x37e   : > { %1940 = vmax.xlane.f32.xlu0 %v1939_v5 }
 0x394   : > { %1995 = vrot.lane.b32.xlu0 %v1976_v22, %s3069_s21 }
 0x40b   : > { %v1941_v6 = vpop.xlane.xlu0 %1940 }
 0x40c   : > { %v1942_v7 = vsub.f32 %v1937_v4, %v1941_v6 }
 0x40e   : > { %v1943_v9 = vmul.f32 1.442695, %v1942_v7 }
 0x40f   : > { %v1996_v10 = vpop.permute.xlu0 %1995 }
 0x410   : > { %2997 = vpow2.f32 %v1943_v9  ;;  %v2008_v11 = vsel %vm2007_vm15, %v424_v8, %v1996_v10 }
 0x411   : > { %2865 = vmatpush3.msk.msra.mxu0 %vm663_vm5, %v2008_v11 }
 0x412   : > { %2869 = vmatprep.subr.mxu0 %v3065_v48 }
 0x41a   : > { %v2998_v12 = vpop.eup %2997 }
 0x41b   : > { %v1945_v13 = vsel %vm1938_vm14, %v2998_v12, 0.0 }
 0x41c   : > { %1946 = vadd.xlane.f32.xlu1 %v1945_v13 }
 0x42d   : > { %1997 = vrot.lane.b32.xlu1 %v1982_v41, %s3069_s21 }
 0x431   : > { %1999 = vrot.lane.b32.xlu1 %v1988_v53, %s3069_s21 }
 0x435   : > { %2001 = vrot.lane.b32.xlu1 %v1994_v62, %s3069_s21 }
 0x4a9   : > { %v1947_v14 = vpop.xlane.xlu1 %1946 }
 0x4aa   : > { %2999 = vrcp.f32 %v1947_v14 }
 0x4ad   : > { %v1998_v17 = vpop.permute.xlu1 %1997 }
 0x4ae   : > { %v2009_v24 = vsel %vm2007_vm15, %v425_v20, %v1998_v17 }
 0x4b1   : > { %v2000_v23 = vpop.permute.xlu1 %1999 }
 0x4b2   : > { %v2010_v27 = vsel %vm2007_vm15, %v426_v25, %v2000_v23 }
 0x4b4   : > { %v3000_v15 = vpop.eup %2999 }
 0x4b5   : > { %v1949_v16 = vmul.f32 %v3000_v15, %v2998_v12  ;;  %v2002_v29 = vpop.permute.xlu1 %2001 }
 0x4b6   : > { %v2011_v31 = vsel %vm2007_vm15, %v427_v28, %v2002_v29 }
 0x4b7   : > { %vm1950_vm0 = vcmp.eq.f32.partialorder %v1949_v16, 0.25 }
 0x4b8   : > { %v1951_v18 = vsel %vm1950_vm0, 0.0, %v1949_v16 }
 0x4b9   : > { %v2019_v19 = vrot.slane %v1951_v18, %v3219_v60 }
 0x4bb   : > { %v2027_v21 = vrot.slane %v2019_v19, %v3219_v60  ;;  %v2020_v22 = vcombine.high %v2019_v19, %v2019_v19 }
 0x4bd   : > { %2867 = vmatmul.mubr.msk.f32.vlgmr.msra.gmra.mrb[12].mxu0 %vm534_vm3, %v2027_v21  ;;  %v2034_v26 = vrot.slane %v2020_v22, %v3219_v60  ;;  %v2035_v30 = vcombine.high %v2027_v21, %v2027_v21 }
 0x4be   : > { %2870 = vmatpush3.msk.msra.mxu0 %vm663_vm5, %v2009_v24  ;;  %2871 = vmatprep.mubr.msk.f32.mxu0 %vm3066_vm6, %v3065_v48 }
 0x4bf   : > { %2874 = vmatprep.subr.mxu0 %v3065_v48  ;;  %v2036_v60 = vcombine.high %v2034_v26, %v2034_v26 }
 0x4c1   : > { %2872 = vmatmul.mubr.msk.f32.vlgmr.msra.gmra.mrb[14].mxu0 %vm534_vm3, %v2034_v26 }
 0x4c2   : > { %2875 = vmatpush3.msk.msra.mxu0 %vm663_vm5, %v2010_v27  ;;  %2876 = vmatprep.mubr.msk.f32.mxu0 %vm3066_vm6, %v3065_v48 }
 0x4c3   : > { %2879 = vmatprep.subr.mxu0 %v3065_v48 }
 0x4c5   : > { %2877 = vmatmul.mubr.msk.f32.vlgmr.msra.gmra.mrb[16].mxu0 %vm534_vm3, %v2035_v30 }
 0x4c6   : > { %2880 = vmatpush3.msk.msra.mxu0 %vm663_vm5, %v2011_v31  ;;  %2881 = vmatprep.mubr.msk.f32.mxu0 %vm3066_vm6, %v3065_v48 }
 0x4c7   : > { %2884 = vmatprep.subr.mxu0 %v3065_v48 }
 0x4c9   : > { %2882 = vmatmul.mubr.msk.f32.vlgmr.msra.gmra.mrb[18].mxu0 %vm534_vm3, %v2036_v60 }
 0x4ca   : > { %2886 = vmatprep.mubr.msk.f32.mxu0 %vm3066_vm6, %v3065_v48 }
 0x590   : > { %v2108_v32 = vpop.f32.mrb[12].mxu0 }
 0x591   : > { %v2868_v33 = vpop.f32.mrb[13].mxu0 }
 0x594   : > { %v2183_v34 = vpop.f32.mrb[14].mxu0 }
 0x595   : > { %v2341_v35 = vrot.slane %v2183_v34, 7  ;;  %v2873_v36 = vpop.f32.mrb[15].mxu0 }
 0x597   : > { %v2342_v37 = vsel %vm1969_vm9, %v2341_v35, %v2108_v32 }
 0x598   : > { %v2258_v38 = vpop.f32.mrb[16].mxu0 }
 0x599   : > { %v2343_v39 = vrot.slane %v2258_v38, 6  ;;  %v2878_v40 = vpop.f32.mrb[17].mxu0 }
 0x59b   : > { %v2344_v41 = vsel %vm1972_vm10, %v2343_v39, %v2342_v37 }
 0x59c   : > { %v2333_v48 = vpop.f32.mrb[18].mxu0 }
 0x59d   : > { %v2345_v42 = vrot.slane %v2333_v48, 5  ;;  %v2883_v43 = vpop.f32.mrb[19].mxu0 }
 0x59f   : > { %v2346_v45 = vsel %vm1975_vm11, %v2345_v42, %v2344_v41 }
 0x5a0   : > { %2885 = vmatpush3.msk.msra.mxu0 %vm663_vm5, %v2346_v45 }
 0x5a1   : > { %2887 = vmatmul.mubr.msk.f32.vlgmr.msra.gmra.mrb[20].mxu0 %vm534_vm3, %v446_v44 }
 0x674   : > { %v2418_v46 = vpop.f32.mrb[20].mxu0 }
 0x675   : > { %2423 = vst.msk [vmem:[%s357_s17] sm:$0xff] %vm2422_vm1, %v2418_v46  ;;  %v2888_v47 = vpop.f32.mrb[21].mxu0 }
 0x676   : > { %3014 = shalt.err (!%p3011_p3)
}
 0x677   : > { %s3015_s9 = scalar_lea.hbm %s3425_s22, 128  ;;  %s3019_s16 = scalar_lea.hbm %s3474_s7, 256 }
 0x678   : > { %p3016_p4 = scmp.ne.s32.totalorder %s3425_s22, %s3015_s9  ;;  %p3020_p9 = scmp.lt.u32.totalorder %s3425_s22, %s3474_s7 }
 0x679   : > { %p3021_p10 = scmp.lt.u32.totalorder %s3019_s16, %s3015_s9  ;;  %p3023_p12 = scmp.lt.u32.totalorder %s3015_s9, %s3425_s22 }
 0x67a   : > { %p3017_p7 = pnand %p3016_p4, %p3149_p5 }
 0x67b   : > { %p3022_p11 = por %p3021_p10, %p3020_p9 }
 0x67c   : > { %p3018_p8 = pneg %p3017_p7 }
 0x67d   : > { %p3024_p13 = por %p3023_p12, %p3022_p11 }
 0x67f   : > { %p3025_p0 = pnand %p3024_p13, %p3018_p8 }
 0x681   : > { %3028 = shalt.err (!%p3025_p0)
}
 0x682   : > { %2945 = dma.vmem_to_hbm [thread:$0]  (%p3149_p5), %s3427_s19, 128, %s3425_s22, %s2425_s23  }
 0x683 PF: > { %p2951_p1 = scmp.ge.s32.totalorder %s3063_s27, 2  ;;  %s2450_s20 = sand.u32 1, %s3051_s24  }
 0x684   : > { %s2451_s21 = scalar_lea.sflag [#allocation3], %s2450_s20 }
 0x685   : > { %p2948_p2 = pnand %p2951_p1, %p3153_p6 }
 0x687   : > { %3046 = dma.done.wait (!%p2948_p2), %s2451_s21, 128  }
 0x688   : > { %3048 = vsyncadd (!%p2948_p2), %s2451_s21, 4294967168  ;;  %p17_p3 = scmp.ge.s32.totalorder %s3136_s30, 4   ;;  %s3477_s24 = smov %s3055_s25 }
 0x689   : > { %s3478_s25 = smov %s3059_s26  ;;  %s3479_s26 = smov %s3147_s10 }
 0x68a   : > { %s3480_s27 = smov %s3136_s30  ;;  %19 = sbr.rel (!%p17_p3) target bundleno = 3 (0x3), region = 101 }
 0x691   :  { %2456 = vsyncpa [#allocation3], 1 }
 0x692   :  { %2458 = vsyncpa [#allocation3 + $0x1], 1 }

</bundles_post_ra>
